<compile_context>
chip_gen: v5e
topology: v5e:2x2
jax: 0.10.0
libtpu: 0.0.40
codegen_flags: <defaults>
</compile_context>

<pallas_src>
import jax
import jax.numpy as jnp
import numpy as np
from jax.experimental import pallas as pl
from jax.experimental.pallas import tpu as pltpu


# ----------------------------------------------------------------------------
# Fused CBAM kernel factory. One grid step processes `Bt` full samples.
#   x:     (Bt, C, HW) f32     — channels on sublanes, HW lane-dense
#   w1:    (cr, C)     f32     — fc1.weight (hidden-major)
#   w2:    (cr, C)     f32     — fc2.weight.T (hidden-major)
#   wsa:   (2*HW, HW)  bf16    — stacked [W_avg; W_max] dense 7x7-conv matrices
#   out:   (Bt, C, HW) f32
# ----------------------------------------------------------------------------
def make_cbam_kernel(cr):
    def kernel(x_ref, w1_ref, w2_ref, wsa_ref, out_ref):
        x = x_ref[...]                                     # (Bt, C, HW)
        bt = x.shape[0]

        # ---- Channel attention: one fused pass over [avg; max] -----------
        s_avg = jnp.mean(x, axis=2)                        # (Bt, C)
        s_max = jnp.max(x, axis=2)                         # (Bt, C)
        s = jnp.concatenate([s_avg, s_max], axis=0)        # (2*Bt, C)

        # Tiny shared MLP on the VPU/XLU (hidden dim cr, e.g. 2): avoids a
        # 98%-dead padded MXU matmul and MXU weight swaps before the big
        # spatial matmul.
        logits = jnp.zeros_like(s)
        for j in range(cr):                                # static unroll
            w1_j = w1_ref[j:j + 1, :]                      # (1, C)
            w2_j = w2_ref[j:j + 1, :]                      # (1, C)
            h_j = jnp.maximum(
                jnp.sum(s * w1_j, axis=1, keepdims=True), 0.0)   # (2*Bt, 1)
            logits = logits + h_j * w2_j                   # (2*Bt, C)

        ca = jax.nn.sigmoid(logits[:bt] + logits[bt:])     # (Bt, C)

        # Channel rescale. Write to out_ref and re-read so x's live range
        # ends here (keeps vreg pressure low at larger batch tiles).
        out_ref[...] = x * ca[:, :, None]
        x1 = out_ref[...]                                  # (Bt, C, HW)

        # ---- Spatial attention: 7x7 conv as ONE bf16 MXU matmul ----------
        avg_c = jnp.mean(x1, axis=1)                       # (Bt, HW)
        max_c = jnp.max(x1, axis=1)                        # (Bt, HW)
        sp = jnp.concatenate([avg_c, max_c], axis=1).astype(jnp.bfloat16)
        sa_logits = jnp.dot(sp, wsa_ref[...],
                            preferred_element_type=jnp.float32)   # (Bt, HW)
        sa = jax.nn.sigmoid(sa_logits)

        out_ref[...] = x1 * sa[:, None, :]                 # per-pixel rescale

    return kernel


# ----------------------------------------------------------------------------
# Turn the (1, 2, k, k) spatial-attention conv weight (stride 1, padding k//2,
# no bias) into a stacked dense (2*HW, HW) matrix so the conv becomes a single
# matmul:  sa_logits[b, o] = [avg[b]; max[b]] @ W_stacked[:, o]
# NOTE(scaling): W grows as HW^2 — fine for 16x16 (256 KiB bf16); for much
# larger images tile the output dim or use a roll-based stencil instead.
# ----------------------------------------------------------------------------
def build_spatial_conv_matrix(w_sa, H, W, dtype=jnp.bfloat16):
    k = w_sa.shape[-1]
    p = k // 2
    dy = jnp.arange(H)[:, None] - jnp.arange(H)[None, :]    # iy - oy, (H, H)
    dx = jnp.arange(W)[:, None] - jnp.arange(W)[None, :]    # ix - ox, (W, W)
    my = jnp.abs(dy) <= p
    mx = jnp.abs(dx) <= p
    ky = jnp.clip(dy + p, 0, k - 1)
    kx = jnp.clip(dx + p, 0, k - 1)
    w = w_sa[0]                                              # (2, k, k)
    # Gather: (2, H, H, W, W) with index dims (c, iy, oy, ix, ox)
    wg = w[:, ky[:, :, None, None], kx[None, None, :, :]]
    wg = wg * (my[:, :, None, None] & mx[None, None, :, :]).astype(w.dtype)
    # Reorder to (c, iy, ix, oy, ox) and flatten to (2*HW, HW): avg rows first.
    wg = wg.transpose(0, 1, 3, 2, 4).reshape(2 * H * W, H * W)
    return wg.astype(dtype)


def _pick_batch_block(B, max_block=8):
    """Largest divisor of B up to max_block that leaves >=2 grid steps
    (keeps v7x's 2 TensorCores busy via the 'parallel' batch axis)."""
    best = 1
    for bb in range(1, min(B, max_block) + 1):
        if B % bb == 0 and (B // bb >= 2 or B == 1):
            best = bb
    return best


# ----------------------------------------------------------------------------
# Wrapper: lay x out as (B, C, H*W), build the stacked conv matrix, run the
# fused kernel with a batch-tiled "parallel" grid.
# ----------------------------------------------------------------------------
def cbam_forward(x, params, *, batch_block=None):
    x = x.astype(jnp.float32)
    B, C, H, W = x.shape
    HW = H * W

    w_fc1 = params["w_fc1"]                     # (cr, C)  fc1.weight
    w_fc2 = params["w_fc2"]                     # (C, cr)  fc2.weight
    cr = w_fc1.shape[0]
    w1k = w_fc1.astype(jnp.float32)             # (cr, C)
    w2k = w_fc2.T.astype(jnp.float32)           # (cr, C)
    wsa = build_spatial_conv_matrix(params["w_sa"], H, W, dtype=jnp.bfloat16)

    if batch_block is None:
        batch_block = _pick_batch_block(B)
    assert B % batch_block == 0, "B must be divisible by batch_block"
    nb = B // batch_block

    xf = x.reshape(B, C, HW)                    # contiguous reshape, no transpose

    out = pl.pallas_call(
        make_cbam_kernel(cr),
        out_shape=jax.ShapeDtypeStruct((B, C, HW), jnp.float32),
        grid_spec=pltpu.PrefetchScalarGridSpec(
            num_scalar_prefetch=0,
            grid=(nb,),
            in_specs=[
                pl.BlockSpec((batch_block, C, HW), lambda b: (b, 0, 0)),
                pl.BlockSpec((cr, C), lambda b: (0, 0)),
                pl.BlockSpec((cr, C), lambda b: (0, 0)),
                pl.BlockSpec((2 * HW, HW), lambda b: (0, 0)),
            ],
            out_specs=pl.BlockSpec((batch_block, C, HW), lambda b: (b, 0, 0)),
        ),
        compiler_params=pltpu.CompilerParams(
            dimension_semantics=("parallel",),
            vmem_limit_bytes=32 * 1024 * 1024,
        ),
    )(xf, w1k, w2k, wsa)

    return out.reshape(B, C, H, W)


# ----------------------------------------------------------------------------
# Parameter init (matches PyTorch layer shapes; all layers bias-free).
# ----------------------------------------------------------------------------
def init_params(key, num_channels=32, reduction_ratio=16, kernel_size=7):
    cr = max(1, num_channels // reduction_ratio)
    k1, k2, k3 = jax.random.split(key, 3)
    # fc1: Conv2d(C, C//r, 1, bias=False)      -> weight (C//r, C)
    # fc2: Conv2d(C//r, C, 1, bias=False)      -> weight (C, C//r)
    # sa : Conv2d(2, 1, 7, pad=3, bias=False)  -> weight (1, 2, 7, 7)
    w_fc1 = 0.3 * jax.random.normal(k1, (cr, num_channels), jnp.float32)
    w_fc2 = 0.3 * jax.random.normal(k2, (num_channels, cr), jnp.float32)
    w_sa = 0.3 * jax.random.normal(k3, (1, 2, kernel_size, kernel_size), jnp.float32)
    return {"w_fc1": w_fc1, "w_fc2": w_fc2, "w_sa": w_sa}


# ----------------------------------------------------------------------------
# Pure-JAX reference mirroring the PyTorch module exactly (for verification).
# ----------------------------------------------------------------------------
def cbam_ref(x, params):
    w_fc1, w_fc2, w_sa = params["w_fc1"], params["w_fc2"], params["w_sa"]
    s_avg = x.mean(axis=(2, 3))
    s_max = x.max(axis=(2, 3))
    mlp = lambda s: jnp.maximum(s @ w_fc1.T, 0.0) @ w_fc2.T
    ca = jax.nn.sigmoid(mlp(s_avg) + mlp(s_max))
    x1 = x * ca[:, :, None, None]
    sp = jnp.concatenate(
        [x1.mean(axis=1, keepdims=True), x1.max(axis=1, keepdims=True)], axis=1)
    sa_logits = jax.lax.conv_general_dilated(
        sp, w_sa, window_strides=(1, 1), padding="SAME",
        dimension_numbers=("NCHW", "OIHW", "NCHW"))
    sa = jax.nn.sigmoid(sa_logits)
    return x1 * sa


if __name__ == "__main__":
    key = jax.random.PRNGKey(0)
    kx, kp = jax.random.split(key)

    # reduction_ratio=16 requires C >= 16; use the module-default C=32 (cr=2).
    B, C, H, W = 2, 32, 16, 16
    x = jax.random.normal(kx, (B, C, H, W), jnp.float32)
    params = init_params(kp, num_channels=C, reduction_ratio=16, kernel_size=7)

    fwd = jax.jit(cbam_forward)
    out = fwd(x, params)
    jax.block_until_ready(out)
    assert out.shape == (B, C, H, W)

    # Correctness check against the pure-JAX reference of the PyTorch module.
    # Tolerance covers bf16 spatial matmul (f32 accumulation) + MXU rounding.
    ref = cbam_ref(x, params)
    np.testing.assert_allclose(np.asarray(out), np.asarray(ref),
                               rtol=2e-2, atol=2e-2)

    print("KERNEL_OK")
</pallas_src>

<mosaic_0001>
module attributes {stable_mosaic.version = 11 : i64} {
  func.func @kernel(%arg0: i32, %arg1: memref<1x32x256xf32, #tpu.memory_space<vmem>>, %arg2: memref<2x32xf32, #tpu.memory_space<vmem>>, %arg3: memref<2x32xf32, #tpu.memory_space<vmem>>, %arg4: memref<512x256xbf16, #tpu.memory_space<vmem>>, %arg5: memref<1x32x256xf32, #tpu.memory_space<vmem>>) attributes {dimension_semantics = [#tpu.dimension_semantics<parallel>], iteration_bounds = array<i64: 2>, scalar_prefetch = 0 : i64, scratch_operands = 0 : i64, tpu.core_type = #tpu.core_type<tc>, window_params = [{transform_indices = @transform_0, window_bounds = array<i64: 1, 32, 256>}, {pipeline_mode = #tpu.pipeline_mode<synchronous>, transform_indices = @transform_1, window_bounds = array<i64: 2, 32>}, {pipeline_mode = #tpu.pipeline_mode<synchronous>, transform_indices = @transform_2, window_bounds = array<i64: 2, 32>}, {pipeline_mode = #tpu.pipeline_mode<synchronous>, transform_indices = @transform_3, window_bounds = array<i64: 512, 256>}, {transform_indices = @transform_4, window_bounds = array<i64: 1, 32, 256>}]} {
    %c0 = arith.constant 0 : index
    %c0_0 = arith.constant 0 : index
    %c0_1 = arith.constant 0 : index
    %0 = vector.load %arg1[%c0, %c0_0, %c0_1] : memref<1x32x256xf32, #tpu.memory_space<vmem>>, vector<1x32x256xf32>
    %cst = arith.constant dense<0.000000e+00> : vector<1x32xf32>
    %1 = vector.multi_reduction <add>, %0, %cst [2] : vector<1x32x256xf32> to vector<1x32xf32>
    %cst_2 = arith.constant 2.560000e+02 : f32
    %2 = vector.broadcast %cst_2 : f32 to vector<1x32xf32>
    %3 = arith.divf %1, %2 : vector<1x32xf32>
    %cst_3 = arith.constant dense<0xFF800000> : vector<1x32xf32>
    %4 = vector.multi_reduction <maximumf>, %0, %cst_3 [2] : vector<1x32x256xf32> to vector<1x32xf32>
    %5 = tpu.concatenate %3, %4 in 0 : vector<1x32xf32>, vector<1x32xf32> -> vector<2x32xf32>
    %cst_4 = arith.constant 0.000000e+00 : f32
    %6 = vector.broadcast %cst_4 : f32 to vector<2x32xf32>
    %c0_5 = arith.constant 0 : index
    %c0_6 = arith.constant 0 : index
    %7 = vector.load %arg2[%c0_5, %c0_6] : memref<2x32xf32, #tpu.memory_space<vmem>>, vector<1x32xf32>
    %c0_7 = arith.constant 0 : index
    %c0_8 = arith.constant 0 : index
    %8 = vector.load %arg3[%c0_7, %c0_8] : memref<2x32xf32, #tpu.memory_space<vmem>>, vector<1x32xf32>
    %9 = vector.broadcast %7 : vector<1x32xf32> to vector<2x32xf32>
    %10 = arith.mulf %5, %9 : vector<2x32xf32>
    %cst_9 = arith.constant dense<0.000000e+00> : vector<2xf32>
    %11 = vector.multi_reduction <add>, %10, %cst_9 [1] : vector<2x32xf32> to vector<2xf32>
    %12 = vector.shape_cast %11 : vector<2xf32> to vector<2x1xf32>
    %cst_10 = arith.constant 0.000000e+00 : f32
    %13 = vector.broadcast %cst_10 : f32 to vector<2x1xf32>
    %14 = arith.maximumf %12, %13 : vector<2x1xf32>
    %15 = vector.broadcast %14 : vector<2x1xf32> to vector<2x32xf32>
    %16 = vector.broadcast %8 : vector<1x32xf32> to vector<2x32xf32>
    %17 = arith.mulf %15, %16 : vector<2x32xf32>
    %18 = arith.addf %6, %17 : vector<2x32xf32>
    %c1 = arith.constant 1 : index
    %c0_11 = arith.constant 0 : index
    %19 = vector.load %arg2[%c1, %c0_11] : memref<2x32xf32, #tpu.memory_space<vmem>>, vector<1x32xf32>
    %c1_12 = arith.constant 1 : index
    %c0_13 = arith.constant 0 : index
    %20 = vector.load %arg3[%c1_12, %c0_13] : memref<2x32xf32, #tpu.memory_space<vmem>>, vector<1x32xf32>
    %21 = vector.broadcast %19 : vector<1x32xf32> to vector<2x32xf32>
    %22 = arith.mulf %5, %21 : vector<2x32xf32>
    %cst_14 = arith.constant dense<0.000000e+00> : vector<2xf32>
    %23 = vector.multi_reduction <add>, %22, %cst_14 [1] : vector<2x32xf32> to vector<2xf32>
    %24 = vector.shape_cast %23 : vector<2xf32> to vector<2x1xf32>
    %cst_15 = arith.constant 0.000000e+00 : f32
    %25 = vector.broadcast %cst_15 : f32 to vector<2x1xf32>
    %26 = arith.maximumf %24, %25 : vector<2x1xf32>
    %27 = vector.broadcast %26 : vector<2x1xf32> to vector<2x32xf32>
    %28 = vector.broadcast %20 : vector<1x32xf32> to vector<2x32xf32>
    %29 = arith.mulf %27, %28 : vector<2x32xf32>
    %30 = arith.addf %18, %29 : vector<2x32xf32>
    %31 = vector.extract_strided_slice %30 {offsets = [0, 0], sizes = [1, 32], strides = [1, 1]} : vector<2x32xf32> to vector<1x32xf32>
    %32 = vector.extract_strided_slice %30 {offsets = [1, 0], sizes = [1, 32], strides = [1, 1]} : vector<2x32xf32> to vector<1x32xf32>
    %33 = arith.addf %31, %32 : vector<1x32xf32>
    %34 = arith.negf %33 : vector<1x32xf32>
    %35 = math.exp %34 : vector<1x32xf32>
    %cst_16 = arith.constant 1.000000e+00 : f32
    %36 = vector.broadcast %cst_16 : f32 to vector<1x32xf32>
    %37 = arith.addf %36, %35 : vector<1x32xf32>
    %38 = arith.divf %36, %37 : vector<1x32xf32>
    %39 = vector.shape_cast %38 : vector<1x32xf32> to vector<1x32x1xf32>
    %40 = vector.broadcast %39 : vector<1x32x1xf32> to vector<1x32x256xf32>
    %41 = arith.mulf %0, %40 : vector<1x32x256xf32>
    %c0_17 = arith.constant 0 : index
    %c0_18 = arith.constant 0 : index
    %c0_19 = arith.constant 0 : index
    %42 = vector.load %arg5[%c0_17, %c0_18, %c0_19] : memref<1x32x256xf32, #tpu.memory_space<vmem>>, vector<1x32x256xf32>
    tpu.vector_store %arg5[%c0_17, %c0_18, %c0_19], %41 {strides = array<i32>} : memref<1x32x256xf32, #tpu.memory_space<vmem>>, vector<1x32x256xf32>,
    %c0_20 = arith.constant 0 : index
    %c0_21 = arith.constant 0 : index
    %c0_22 = arith.constant 0 : index
    %43 = vector.load %arg5[%c0_20, %c0_21, %c0_22] : memref<1x32x256xf32, #tpu.memory_space<vmem>>, vector<1x32x256xf32>
    %cst_23 = arith.constant dense<0.000000e+00> : vector<1x256xf32>
    %44 = vector.multi_reduction <add>, %43, %cst_23 [1] : vector<1x32x256xf32> to vector<1x256xf32>
    %cst_24 = arith.constant 3.200000e+01 : f32
    %45 = vector.broadcast %cst_24 : f32 to vector<1x256xf32>
    %46 = arith.divf %44, %45 : vector<1x256xf32>
    %cst_25 = arith.constant dense<0xFF800000> : vector<1x256xf32>
    %47 = vector.multi_reduction <maximumf>, %43, %cst_25 [1] : vector<1x32x256xf32> to vector<1x256xf32>
    %48 = tpu.concatenate %46, %47 in 1 : vector<1x256xf32>, vector<1x256xf32> -> vector<1x512xf32>
    %49 = arith.truncf %48 : vector<1x512xf32> to vector<1x512xbf16>
    %c0_26 = arith.constant 0 : index
    %c0_27 = arith.constant 0 : index
    %50 = vector.load %arg4[%c0_26, %c0_27] : memref<512x256xbf16, #tpu.memory_space<vmem>>, vector<512x256xbf16>
    %cst_28 = arith.constant dense<0.000000e+00> : vector<1x256xf32>
    %51 = tpu.matmul %49, %50, %cst_28 {dimension_numbers = #tpu.dot_dimension_numbers<[1], [0], [0], [1], [0, 0, 1, 1], [], []>} : vector<1x512xbf16>, vector<512x256xbf16>, vector<1x256xf32> -> vector<1x256xf32>
    %52 = arith.negf %51 : vector<1x256xf32>
    %53 = math.exp %52 : vector<1x256xf32>
    %cst_29 = arith.constant 1.000000e+00 : f32
    %54 = vector.broadcast %cst_29 : f32 to vector<1x256xf32>
    %55 = arith.addf %54, %53 : vector<1x256xf32>
    %56 = arith.divf %54, %55 : vector<1x256xf32>
    %57 = vector.shape_cast %56 : vector<1x256xf32> to vector<1x1x256xf32>
    %58 = vector.broadcast %57 : vector<1x1x256xf32> to vector<1x32x256xf32>
    %59 = arith.mulf %43, %58 : vector<1x32x256xf32>
    %c0_30 = arith.constant 0 : index
    %c0_31 = arith.constant 0 : index
    %c0_32 = arith.constant 0 : index
    %60 = vector.load %arg5[%c0_30, %c0_31, %c0_32] : memref<1x32x256xf32, #tpu.memory_space<vmem>>, vector<1x32x256xf32>
    tpu.vector_store %arg5[%c0_30, %c0_31, %c0_32], %59 {strides = array<i32>} : memref<1x32x256xf32, #tpu.memory_space<vmem>>, vector<1x32x256xf32>,
    return
  }
  func.func @transform_0(%arg0: i32) -> (i32, i32, i32) {
    %c0_i32 = arith.constant 0 : i32
    %c0_i32_0 = arith.constant 0 : i32
    %c0_i32_1 = arith.constant 0 : i32
    return %arg0, %c0_i32, %c0_i32_0 : i32, i32, i32
  }
  func.func @transform_1(%arg0: i32) -> (i32, i32) {
    %c0_i32 = arith.constant 0 : i32
    %c0_i32_0 = arith.constant 0 : i32
    %c0_i32_1 = arith.constant 0 : i32
    return %c0_i32, %c0_i32_0 : i32, i32
  }
  func.func @transform_2(%arg0: i32) -> (i32, i32) {
    %c0_i32 = arith.constant 0 : i32
    %c0_i32_0 = arith.constant 0 : i32
    %c0_i32_1 = arith.constant 0 : i32
    return %c0_i32, %c0_i32_0 : i32, i32
  }
  func.func @transform_3(%arg0: i32) -> (i32, i32) {
    %c0_i32 = arith.constant 0 : i32
    %c0_i32_0 = arith.constant 0 : i32
    %c0_i32_1 = arith.constant 0 : i32
    return %c0_i32, %c0_i32_0 : i32, i32
  }
  func.func @transform_4(%arg0: i32) -> (i32, i32, i32) {
    %c0_i32 = arith.constant 0 : i32
    %c0_i32_0 = arith.constant 0 : i32
    %c0_i32_1 = arith.constant 0 : i32
    return %arg0, %c0_i32, %c0_i32_0 : i32, i32, i32
  }
}

</mosaic_0001>

<bundles_post_ra>
// kernel: cbam_forward.1
= control target key start
LH: loop header
LB: loop body
LE: loop exit
PB: predicated region body
PF: predicated region fallthrough
CT: control target
= control target key end

     0   :  { %s1424_s15 = smov 0   ;;  %s1945_s0 = inlined_call_operand.vmem [shape: f32[2,32,256], index: 0, kind: input, shape index: {}]   ;;  %s1946_s1 = inlined_call_operand.vmem [shape: f32[2,32], index: 1, kind: input, shape index: {}]   ;;  %s1947_s2 = inlined_call_operand.vmem [shape: f32[2,32], index: 2, kind: input, shape index: {}]   ;;  %s1948_s3 = inlined_call_operand.vmem [shape: bf16[512,256], index: 3, kind: input, shape index: {}]   ;;  %s1949_s4 = inlined_call_operand.vmem [shape: f32[2,32,256], index: 4, kind: output, shape index: {}]  }
   0x1 LB: > { %s1018_s16 = sadd.s32 4294967295, %s1395_s15   ;;  %p1022_p0 = scmp.ge.s32.totalorder %s1395_s15, 1  ;;  %s1395_s15 = sphi %s1424_s15, %s14_s15  }
   0x2   : > { %p162_p1 = scmp.lt.s32.totalorder %s1395_s15, 3 }
   0x4   : > { %p163_p2 = pnand %p1022_p0, %p162_p1 }
   0x5   : > { %p188_p3 = scmp.lt.s32.totalorder (!%p163_p2), %s1018_s16, 1 }
   0x6   : > { %166 = sbr.rel (%p163_p2) target bundleno = 637 (0x27d), region = 36 }
   0xb   : > { %s1951_s16 = smov (!%p188_p3, %s1018_s16), 1  ;;  %v1397_v16 = vmov 256.0   ;;  %v245_v25 = vlaneseq  ;;  %vm250_vm1 = vcmask 130112   ;;  %vm254_vm2 = vcmask 195712   ;;  %v1369_v51 = vld [vmem:[%s1946_s1 + $0x1] ss:$0 sm:$0xff] }
   0xc   : > { %s1288_s17 = sshll.u32 %s1951_s16, 6  ;;  %1373 = vrcp.f32 %v1397_v16  ;;  %vm258_vm3 = vcmask 261312   ;;  %vm273_vm4 = vcmask 1040384   ;;  %v1370_v52 = vld [vmem:[%s1946_s1] ss:$0 sm:$0xff]  ;;  %vm279_vm5 = vcmask 254976  }
   0xd   : > { %s192_s20 = scalar_lea.vmem %s1945_s0, %s1288_s17  ;;  %v246_v27 = vand.u32 127, %v245_v25  ;;  %v323_v61 = vshrl.u32 %v245_v25, 7  ;;  %s1924_s8 = scalar_lea.vmem %s1949_s4, %s1288_s17 }
   0xe   : > { %v1440_v0 = vld [vmem:[%s192_s20] sm:$0xff]  ;;  %v1442_v1 = vld [vmem:[%s192_s20 + $0x8] sm:$0xff]  ;;  %v1454_v7 = vld [vmem:[%s192_s20 + $0x10] sm:$0xff] }
   0xf   : > { %v1444_v2 = vld [vmem:[%s192_s20 + $0x20] sm:$0xff]  ;;  %v229_v3 = vmax.f32 %v1440_v0, %v1442_v1  ;;  %v206_v4 = vadd.f32 %v1442_v1, %v1440_v0  ;;  %v1450_v5 = vld [vmem:[%s192_s20 + $0x28] sm:$0xff]  ;;  %v1456_v8 = vld [vmem:[%s192_s20 + $0x18] sm:$0xff]  ;;  %v248_v30 = vadd.s32 4294967288, %v246_v27  ;;  %v252_v33 = vadd.s32 4294967280, %v246_v27  ;;  %1364 = vset.pattern.permute.xlu1 %v323_v61 }
  0x10   : > { %v212_v6 = vadd.f32 %v1450_v5, %v1444_v2  ;;  %v1458_v9 = vld [vmem:[%s192_s20 + $0x30] sm:$0xff]  ;;  %v1460_v10 = vld [vmem:[%s192_s20 + $0x38] sm:$0xff]  ;;  %v232_v11 = vmax.f32 %v1454_v7, %v1456_v8  ;;  %v209_v12 = vadd.f32 %v1456_v8, %v1454_v7  ;;  %v235_v14 = vmax.f32 %v1444_v2, %v1450_v5 }
  0x11   : > { %230 = vmax.xlane.f32.xlu2 %v229_v3  ;;  %207 = vadd.xlane.f32.xlu0 %v206_v4  ;;  %v215_v13 = vadd.f32 %v1460_v10, %v1458_v9  ;;  %v238_v15 = vmax.f32 %v1458_v9, %v1460_v10  ;;  %v256_v38 = vadd.s32 4294967272, %v246_v27  ;;  %v336_v62 = vadd.s32 16, %v323_v61  ;;  %v1371_v3 = vld [vmem:[%s1947_s2 + $0x1] ss:$0 sm:$0xff]  ;;  %v1372_v4 = vld [vmem:[%s1947_s2] ss:$0 sm:$0xff] }
  0x12   : > { %213 = vadd.xlane.f32.xlu1 %v212_v6  ;;  %v1374_v17 = vpop.eup %1373  ;;  %v330_v63 = vadd.s32 8, %v323_v61 }
  0x13   : > { %v219_v18 = vmul.f32 256.0, %v1374_v17  ;;  %vm223_vm0 = vweird.f32 %v1374_v17  ;;  %1366 = vset.pattern.permute.xlu0 %v336_v62  ;;  %v1349_v62 = vld [vmem:[%s1948_s3 + $0x1d4] sm:$0xf0] }
  0x14   : > { %1365 = vset.pattern.permute.xlu2 %v330_v63 }
  0x15   : > { %v220_v19 = vsub.f32 1.0, %v219_v18 }
  0x17   : > { %v221_v20 = vmul.f32 %v1374_v17, %v220_v19 }
  0x19   : > { %233 = vmax.xlane.f32.xlu2 %v232_v11  ;;  %210 = vadd.xlane.f32.xlu0 %v209_v12  ;;  %v222_v23 = vadd.f32 %v1374_v17, %v221_v20 }
  0x1a   : > { %216 = vadd.xlane.f32.xlu1 %v215_v13 }
  0x1b   : > { %v224_v26 = vsel %vm223_vm0, %v1374_v17, %v222_v23 }
  0x21   : > { %236 = vmax.xlane.f32.xlu0 %v235_v14 }
  0x22   : > { %239 = vmax.xlane.f32.xlu1 %v238_v15 }
  0x84   : > { %v208_v21 = vpop.xlane.xlu0 %207  ;;  %v231_v22 = vpop.xlane.xlu2 %230 }
  0x85   : > { %v214_v24 = vpop.xlane.xlu1 %213  ;;  %v225_v28 = vmul.f32 %v224_v26, %v208_v21  ;;  %v265_v40 = vperm.slane %v231_v22, %v246_v27 }
  0x86   : > { %v227_v34 = vmul.f32 %v224_v26, %v214_v24 }
  0x87   : > { %v247_v37 = vperm.slane %v225_v28, %v246_v27 }
  0x88   : > { %v253_v43 = vperm.slane %v227_v34, %v252_v33  ;;  %v1214_v34 = vld [vmem:[%s1948_s3 + $0x170] sm:$0xf] }
  0x8c   : > { %v211_v29 = vpop.xlane.xlu0 %210  ;;  %v234_v35 = vpop.xlane.xlu2 %233 }
  0x8d   : > { %v226_v31 = vmul.f32 %v224_v26, %v211_v29  ;;  %v217_v32 = vpop.xlane.xlu1 %216  ;;  %v266_v41 = vperm.slane %v234_v35, %v248_v30  ;;  %v1337_v35 = vld [vmem:[%s1948_s3 + $0x174] sm:$0xf0] }
  0x8e   : > { %v228_v39 = vmul.f32 %v224_v26, %v217_v32 }
  0x8f   : > { %v249_v36 = vperm.slane %v226_v31, %v248_v30  ;;  %v267_v49 = vsel %vm250_vm1, %v266_v41, %v265_v40  ;;  %v1086_v40 = vld [vmem:[%s1948_s3 + $0x70] sm:$0xf]  ;;  %v1305_v41 = vld [vmem:[%s1948_s3 + $0x74] sm:$0xf0] }
  0x90   : > { %v257_v44 = vperm.slane %v228_v39, %v256_v38 }
  0x91   : > { %v251_v42 = vsel %vm250_vm1, %v249_v36, %v247_v37  ;;  %v1278_v36 = vld [vmem:[%s1948_s3 + $0x1f0] sm:$0xf]  ;;  %v1215_v37 = vor.u32 %v1337_v35, %v1214_v34 }
  0x92   : > { %v255_v48 = vsel %vm254_vm2, %v253_v43, %v251_v42  ;;  %v1150_v42 = vld [vmem:[%s1948_s3 + $0xf0] sm:$0xf]  ;;  %v1087_v43 = vor.u32 %v1305_v41, %v1086_v40  ;;  %v1238_v41 = vld [vmem:[%s1948_s3 + $0x1a0] sm:$0xf] }
  0x93   : > { %v259_v55 = vsel %vm258_vm3, %v257_v44, %v255_v48  ;;  %829 = vmatpush.bf16.msra.mxu2 %v1215_v37  ;;  %v1321_v44 = vld [vmem:[%s1948_s3 + $0xf4] sm:$0xf0]  ;;  %v1118_v34 = vld [vmem:[%s1948_s3 + $0xb0] sm:$0xf]  ;;  %v1174_v37 = vld [vmem:[%s1948_s3 + $0x120] sm:$0xf] }
  0x94   : > { %v237_v45 = vpop.xlane.xlu0 %236  ;;  %803 = vmatpush.bf16.msra.mxu0 %v1087_v43 }
  0x95   : > { %v268_v46 = vperm.slane %v237_v45, %v252_v33  ;;  %v240_v47 = vpop.xlane.xlu1 %239  ;;  %v342_v33 = vadd.s32 24, %v323_v61  ;;  %v1206_v45 = vld [vmem:[%s1948_s3 + $0x160] sm:$0xf]  ;;  %v1262_v61 = vld [vmem:[%s1948_s3 + $0x1d0] sm:$0xf] }
  0x96   : > { %v270_v50 = vperm.slane %v240_v47, %v256_v38  ;;  %v1353_v38 = vld [vmem:[%s1948_s3 + $0x1f4] sm:$0xf0]  ;;  %v1151_v47 = vor.u32 %v1321_v44, %v1150_v42  ;;  %v1263_v63 = vor.u32 %v1349_v62, %v1262_v61  ;;  %v1343_v42 = vld [vmem:[%s1948_s3 + $0x1a4] sm:$0xf0]  ;;  %v1046_v44 = vld [vmem:[%s1948_s3 + $0x20] sm:$0xf] }
  0x97   : > { %v269_v53 = vsel %vm254_vm2, %v268_v46, %v267_v49  ;;  %v1279_v39 = vor.u32 %v1353_v38, %v1278_v36  ;;  %v1335_v46 = vld [vmem:[%s1948_s3 + $0x164] sm:$0xf0]  ;;  %v1270_v49 = vld [vmem:[%s1948_s3 + $0x1e0] sm:$0xf]  ;;  %v1313_v36 = vld [vmem:[%s1948_s3 + $0xb4] sm:$0xf0]  ;;  %v1239_v43 = vor.u32 %v1343_v42, %v1238_v41 }
  0x98   : > { %v271_v54 = vsel %vm258_vm3, %v270_v50, %v269_v53  ;;  %v1207_v48 = vor.u32 %v1335_v46, %v1206_v45  ;;  %v1351_v50 = vld [vmem:[%s1948_s3 + $0x1e4] sm:$0xf0]  ;;  %816 = vmatpush.bf16.msra.mxu1 %v1151_v47  ;;  %v1110_v46 = vld [vmem:[%s1948_s3 + $0xa0] sm:$0xf]  ;;  %v1332_v41 = vld [vmem:[%s1948_s3 + $0x154] sm:$0xf] }
  0x99   : > { %v274_v56 = vsel %vm273_vm4, %v259_v55, %v271_v54  ;;  %842 = vmatpush.bf16.msra.mxu3 %v1279_v39  ;;  %v1303_v53 = vld [vmem:[%s1948_s3 + $0x64] sm:$0xf0]  ;;  %v1142_v54 = vld [vmem:[%s1948_s3 + $0xe0] sm:$0xf]  ;;  %v1119_v39 = vor.u32 %v1313_v36, %v1118_v34  ;;  %v1302_v36 = vld [vmem:[%s1948_s3 + $0x64] sm:$0xf] }
  0x9a   : > { %v290_v57 = vmul.f32 %v1369_v51, %v274_v56  ;;  %v278_v58 = vmul.f32 %v1370_v52, %v274_v56  ;;  %v1271_v51 = vor.u32 %v1351_v50, %v1270_v49  ;;  %830 = vmatpush.bf16.msra.mxu2 %v1207_v48  ;;  %v1078_v52 = vld [vmem:[%s1948_s3 + $0x60] sm:$0xf]  ;;  %v1319_v56 = vld [vmem:[%s1948_s3 + $0xe4] sm:$0xf0]  ;;  %v1166_v49 = vld [vmem:[%s1948_s3 + $0x110] sm:$0xf] }
  0x9b   : > { %v1079_v55 = vor.u32 %v1303_v53, %v1078_v52  ;;  %v1327_v38 = vld [vmem:[%s1948_s3 + $0x124] sm:$0xf0]  ;;  %v1325_v50 = vld [vmem:[%s1948_s3 + $0x114] sm:$0xf0]  ;;  %v1230_v53 = vld [vmem:[%s1948_s3 + $0x190] sm:$0xf] }
  0x9c   : > { %v291_v59 = vsel %vm279_vm5, %v290_v57, 0.0  ;;  %v280_v60 = vsel %vm279_vm5, %v278_v58, 0.0  ;;  %v1198_v57 = vld [vmem:[%s1948_s3 + $0x150] sm:$0xf]  ;;  %v1333_v58 = vld [vmem:[%s1948_s3 + $0x154] sm:$0xf0]  ;;  %v1175_v40 = vor.u32 %v1327_v38, %v1174_v37  ;;  %v1167_v52 = vor.u32 %v1325_v50, %v1166_v49 }
  0x9d   : > { %292 = vadd.xlane.f32.xlu0 %v291_v59  ;;  %281 = vadd.xlane.f32.xlu2 %v280_v60  ;;  %v1143_v59 = vor.u32 %v1319_v56, %v1142_v54  ;;  %v1199_v60 = vor.u32 %v1333_v58, %v1198_v57  ;;  %v1295_v45 = vld [vmem:[%s1948_s3 + $0x24] sm:$0xf0]  ;;  %v1341_v54 = vld [vmem:[%s1948_s3 + $0x194] sm:$0xf0]  ;;  %v1038_v56 = vld [vmem:[%s1948_s3 + $0x10] sm:$0xf] }
  0x9e   : > { %843 = vmatpush.bf16.msra.mxu3 %v1271_v51  ;;  %804 = vmatpush.bf16.msra.mxu0 %v1079_v55  ;;  %v1047_v47 = vor.u32 %v1295_v45, %v1046_v44  ;;  %v1311_v48 = vld [vmem:[%s1948_s3 + $0xa4] sm:$0xf0]  ;;  %v1231_v55 = vor.u32 %v1341_v54, %v1230_v53  ;;  %v1293_v57 = vld [vmem:[%s1948_s3 + $0x14] sm:$0xf0]  ;;  %v1102_v58 = vld [vmem:[%s1948_s3 + $0x90] sm:$0xf] }
  0x9f   : > { %817 = vmatpush.bf16.msra.mxu1 %v1143_v59  ;;  %831 = vmatpush.bf16.msra.mxu2 %v1199_v60  ;;  %v1111_v51 = vor.u32 %v1311_v48, %v1110_v46  ;;  %v1039_v59 = vor.u32 %v1293_v57, %v1038_v56  ;;  %v1309_v60 = vld [vmem:[%s1948_s3 + $0x94] sm:$0xf0]  ;;  %v1158_v61 = vld [vmem:[%s1948_s3 + $0x100] sm:$0xf]  ;;  %v1323_v62 = vld [vmem:[%s1948_s3 + $0x104] sm:$0xf0] }
  0xa0   : > { %v1080_v37 = vld [vmem:[%s1948_s3 + $0x68] sm:$0xf0]  ;;  %v1318_v38 = vld [vmem:[%s1948_s3 + $0xe4] sm:$0xf]  ;;  %v1200_v42 = vld [vmem:[%s1948_s3 + $0x158] sm:$0xf0] }
  0xa1   : > { %v1203_v44 = vor.u32 %v1332_v41, %v1200_v42  ;;  %v1348_v45 = vld [vmem:[%s1948_s3 + $0x1d4] sm:$0xf]  ;;  %v1264_v46 = vld [vmem:[%s1948_s3 + $0x1d8] sm:$0xf0]  ;;  %v1192_v53 = vld [vmem:[%s1948_s3 + $0x148] sm:$0xf0] }
  0xa2   : > { %844 = vmatpush.bf16.msra.mxu3 %v1263_v63  ;;  %v1103_v63 = vor.u32 %v1309_v60, %v1102_v58  ;;  %v1267_v48 = vor.u32 %v1348_v45, %v1264_v46  ;;  %v1072_v49 = vld [vmem:[%s1948_s3 + $0x58] sm:$0xf0]  ;;  %v1316_v50 = vld [vmem:[%s1948_s3 + $0xd4] sm:$0xf]  ;;  %v1346_v54 = vld [vmem:[%s1948_s3 + $0x1c4] sm:$0xf] }
  0xa3   : > { %v1256_v56 = vld [vmem:[%s1948_s3 + $0x1c8] sm:$0xf0]  ;;  %v1232_v41 = vld [vmem:[%s1948_s3 + $0x198] sm:$0xf0]  ;;  %v1292_v42 = vld [vmem:[%s1948_s3 + $0x14] sm:$0xf] }
  0xa4   : > { %v1308_v45 = vld [vmem:[%s1948_s3 + $0x94] sm:$0xf]  ;;  %v1104_v46 = vld [vmem:[%s1948_s3 + $0x98] sm:$0xf0] }
 0x110   : > { %v293_v6 = vpop.xlane.xlu0 %292  ;;  %v282_v11 = vpop.xlane.xlu2 %281 }
 0x111   : > { %v294_v12 = vmax.f32 %v293_v6, 0.0  ;;  %v283_v13 = vmax.f32 %v282_v11, 0.0  ;;  %v1134_v6 = vld [vmem:[%s1948_s3 + $0xd0] sm:$0xf] }
 0x113   : > { %v296_v14 = vmul.f32 %v1371_v3, %v294_v12  ;;  %v285_v15 = vmul.f32 %v1372_v4, %v283_v13  ;;  %v1070_v3 = vld [vmem:[%s1948_s3 + $0x50] sm:$0xf]  ;;  %v1301_v4 = vld [vmem:[%s1948_s3 + $0x54] sm:$0xf0]  ;;  %v1190_v13 = vld [vmem:[%s1948_s3 + $0x140] sm:$0xf] }
 0x114   : > { %v1071_v11 = vor.u32 %v1301_v4, %v1070_v3  ;;  %v1317_v12 = vld [vmem:[%s1948_s3 + $0xd4] sm:$0xf0]  ;;  %v1159_v3 = vor.u32 %v1323_v62, %v1158_v61  ;;  %v1222_v4 = vld [vmem:[%s1948_s3 + $0x180] sm:$0xf]  ;;  %v1298_v61 = vld [vmem:[%s1948_s3 + $0x44] sm:$0xf] }
 0x115   : > { %v297_v16 = vadd.f32 %v296_v14, %v285_v15  ;;  %v1331_v14 = vld [vmem:[%s1948_s3 + $0x144] sm:$0xf0]  ;;  %v1135_v15 = vor.u32 %v1317_v12, %v1134_v6  ;;  %v1064_v62 = vld [vmem:[%s1948_s3 + $0x48] sm:$0xf0] }
 0x116   : > { %805 = vmatpush.bf16.msra.mxu0 %v1071_v11  ;;  %v1339_v6 = vld [vmem:[%s1948_s3 + $0x184] sm:$0xf0]  ;;  %v1336_v11 = vld [vmem:[%s1948_s3 + $0x174] sm:$0xf] }
 0x117   : > { %v299_v17 = vrot.slane %v297_v16, 1  ;;  %818 = vmatpush.bf16.msra.mxu1 %v1135_v15  ;;  %v1223_v12 = vor.u32 %v1339_v6, %v1222_v4  ;;  %v1280_v15 = vld [vmem:[%s1948_s3 + $0x1f8] sm:$0xf0]  ;;  %v1128_v4 = vld [vmem:[%s1948_s3 + $0xc8] sm:$0xf0] }
 0x118   : > { %v1328_v6 = vld [vmem:[%s1948_s3 + $0x134] sm:$0xf] }
 0x119   : > { %v301_v18 = vadd.f32 %v299_v17, %v297_v16  ;;  %v1191_v16 = vor.u32 %v1331_v14, %v1190_v13  ;;  %v1254_v17 = vld [vmem:[%s1948_s3 + $0x1c0] sm:$0xf]  ;;  %v1216_v13 = vld [vmem:[%s1948_s3 + $0x178] sm:$0xf0]  ;;  %v1352_v14 = vld [vmem:[%s1948_s3 + $0x1f4] sm:$0xf] }
 0x11b   : > { %v1027_v19 = vmul.f32 -1.442695, %v301_v18  ;;  %v1347_v18 = vld [vmem:[%s1948_s3 + $0x1c4] sm:$0xf0]  ;;  %832 = vmatpush.bf16.msra.mxu2 %v1191_v16  ;;  %v1219_v16 = vor.u32 %v1336_v11, %v1216_v13  ;;  %v1184_v11 = vld [vmem:[%s1948_s3 + $0x138] sm:$0xf0] }
 0x11c   : > { %v1187_v13 = vor.u32 %v1328_v6, %v1184_v11  ;;  %v1032_v6 = vld [vmem:[%s1948_s3 + $0x8] sm:$0xf0]  ;;  %v1306_v11 = vld [vmem:[%s1948_s3 + $0x84] sm:$0xf] }
 0x11d   : > { %1375 = vpow2.f32 %v1027_v19  ;;  %v1255_v19 = vor.u32 %v1347_v18, %v1254_v17  ;;  %v1283_v17 = vor.u32 %v1352_v14, %v1280_v15  ;;  %v1030_v18 = vld [vmem:[%s1948_s3] sm:$0xf]  ;;  %v1344_v14 = vld [vmem:[%s1948_s3 + $0x1b4] sm:$0xf]  ;;  %v1248_v15 = vld [vmem:[%s1948_s3 + $0x1b8] sm:$0xf0] }
 0x11f   : > { %845 = vmatpush.bf16.msra.mxu3 %v1255_v19  ;;  %v1291_v19 = vld [vmem:[%s1948_s3 + $0x4] sm:$0xf0] }
 0x123   : > { %v1376_v20 = vpop.eup %1375 }
 0x124   : > { %v305_v21 = vadd.f32 1.0, %v1376_v20  ;;  %v1062_v20 = vld [vmem:[%s1948_s3 + $0x40] sm:$0xf] }
 0x126   : > { %1377 = vrcp.f32 %v305_v21  ;;  %v317_v25 = vand.u32 2147483648, %v305_v21  ;;  %v315_v27 = vand.u32 2147483647, %v305_v21  ;;  %vm311_vm7 = vweird.f32 %v305_v21 }
 0x128   : > { %v318_v29 = vor.u32 1.1754944e-38, %v317_v25  ;;  %vm316_vm9 = vcmp.eq.f32.partialorder %v315_v27, 8.507059e+37  ;;  %v1182_v25 = vld [vmem:[%s1948_s3 + $0x130] sm:$0xf] }
 0x12c   : > { %v1378_v22 = vpop.eup %1377 }
 0x12d   : > { %v307_v23 = vmul.f32 %v1378_v22, %v305_v21  ;;  %vm312_vm6 = vweird.f32 %v1378_v22  ;;  %v1299_v21 = vld [vmem:[%s1948_s3 + $0x44] sm:$0xf0] }
 0x12e   : > { %vm313_vm8 = vmor %vm311_vm7, %vm312_vm6 }
 0x12f   : > { %v308_v24 = vsub.f32 1.0, %v307_v23  ;;  %v1063_v23 = vor.u32 %v1299_v21, %v1062_v20  ;;  %v1094_v20 = vld [vmem:[%s1948_s3 + $0x80] sm:$0xf]  ;;  %v1031_v21 = vor.u32 %v1291_v19, %v1030_v18  ;;  %v1056_v18 = vld [vmem:[%s1948_s3 + $0x38] sm:$0xf0] }
 0x130   : > { %v1312_v19 = vld [vmem:[%s1948_s3 + $0xb4] sm:$0xf] }
 0x131   : > { %v309_v26 = vmul.f32 %v1378_v22, %v308_v24  ;;  %v1315_v24 = vld [vmem:[%s1948_s3 + $0xc4] sm:$0xf0]  ;;  %806 = vmatpush.bf16.msra.mxu0 %v1063_v23  ;;  %v1304_v23 = vld [vmem:[%s1948_s3 + $0x74] sm:$0xf] }
 0x133   : > { %v310_v28 = vadd.f32 %v1378_v22, %v309_v26  ;;  %v1329_v26 = vld [vmem:[%s1948_s3 + $0x134] sm:$0xf0] }
 0x135   : > { %v314_v30 = vsel %vm313_vm8, %v1378_v22, %v310_v28  ;;  %v1126_v22 = vld [vmem:[%s1948_s3 + $0xc0] sm:$0xf]  ;;  %v1183_v28 = vor.u32 %v1329_v26, %v1182_v25 }
 0x136   : > { %v319_v31 = vsel %vm316_vm9, %v318_v29, %v314_v30  ;;  %v1127_v27 = vor.u32 %v1315_v24, %v1126_v22  ;;  %v1246_v29 = vld [vmem:[%s1948_s3 + $0x1b0] sm:$0xf]  ;;  %v1345_v30 = vld [vmem:[%s1948_s3 + $0x1b4] sm:$0xf0]  ;;  %v1307_v22 = vld [vmem:[%s1948_s3 + $0x84] sm:$0xf0] }
 0x137   : > { %v321_v32 = vperm.slane %v319_v31, 0  ;;  %v1247_v31 = vor.u32 %v1345_v30, %v1246_v29  ;;  %833 = vmatpush.bf16.msra.mxu2 %v1183_v28  ;;  %v1088_v24 = vld [vmem:[%s1948_s3 + $0x78] sm:$0xf0]  ;;  %v1095_v25 = vor.u32 %v1307_v22, %v1094_v20  ;;  %v1334_v29 = vld [vmem:[%s1948_s3 + $0x164] sm:$0xf] }
 0x138   : > { %819 = vmatpush.bf16.msra.mxu1 %v1127_v27  ;;  %v1091_v26 = vor.u32 %v1304_v23, %v1088_v24  ;;  %v1320_v27 = vld [vmem:[%s1948_s3 + $0xf4] sm:$0xf]  ;;  %v1152_v28 = vld [vmem:[%s1948_s3 + $0xf8] sm:$0xf0]  ;;  %v1326_v22 = vld [vmem:[%s1948_s3 + $0x124] sm:$0xf] }
 0x139   : > { %338 = vperm.xlu0 %1366, %v321_v32   ;;  %332 = vperm.xlu2 %1365, %v321_v32   ;;  %v1155_v30 = vor.u32 %v1320_v27, %v1152_v28  ;;  %v1398_v23 = vmov 32.0   ;;  %v1240_v27 = vld [vmem:[%s1948_s3 + $0x1a8] sm:$0xf0] }
 0x13a   : > { %326 = vperm.xlu1 %1364, %v321_v32   ;;  %846 = vmatpush.bf16.msra.mxu3 %v1247_v31  ;;  %v1208_v31 = vld [vmem:[%s1948_s3 + $0x168] sm:$0xf0]  ;;  %1379 = vrcp.f32 %v1398_v23 }
 0x13b   : > { %834 = vmatpush.bf16.msra.mxu2 %v1175_v40  ;;  %v1211_v34 = vor.u32 %v1334_v29, %v1208_v31  ;;  %v1144_v40 = vld [vmem:[%s1948_s3 + $0xe8] sm:$0xf0]  ;;  %v1294_v29 = vld [vmem:[%s1948_s3 + $0x24] sm:$0xf] }
 0x13c   : > { %820 = vmatpush.bf16.msra.mxu1 %v1119_v39  ;;  %v1083_v39 = vor.u32 %v1302_v36, %v1080_v37  ;;  %v1310_v31 = vld [vmem:[%s1948_s3 + $0xa4] sm:$0xf]  ;;  %v1324_v36 = vld [vmem:[%s1948_s3 + $0x114] sm:$0xf]  ;;  %v1168_v37 = vld [vmem:[%s1948_s3 + $0x118] sm:$0xf0] }
 0x13e   : > { %847 = vmatpush.bf16.msra.mxu3 %v1239_v43  ;;  %v1147_v43 = vor.u32 %v1318_v38, %v1144_v40  ;;  %v1340_v40 = vld [vmem:[%s1948_s3 + $0x194] sm:$0xf] }
 0x13f   : > { %835 = vmatpush.bf16.msra.mxu2 %v1167_v52  ;;  %v1330_v52 = vld [vmem:[%s1948_s3 + $0x144] sm:$0xf] }
 0x140   : > { %821 = vmatpush.bf16.msra.mxu1 %v1111_v51  ;;  %v1136_v51 = vld [vmem:[%s1948_s3 + $0xd8] sm:$0xf0]  ;;  %v1195_v58 = vor.u32 %v1330_v52, %v1192_v53  ;;  %v1338_v52 = vld [vmem:[%s1948_s3 + $0x184] sm:$0xf]  ;;  %v1861_v53 = vpop.eup %1379 }
 0x141   : > { %1367 = vset.pattern.permute.xlu2 %v342_v33  ;;  %1368 = vset.pattern.permute.xlu0 %v342_v33  ;;  %v1297_v33 = vld [vmem:[%s1948_s3 + $0x34] sm:$0xf0]  ;;  %v1139_v57 = vor.u32 %v1316_v50, %v1136_v51  ;;  %v1322_v50 = vld [vmem:[%s1948_s3 + $0x104] sm:$0xf]  ;;  %v1160_v51 = vld [vmem:[%s1948_s3 + $0x108] sm:$0xf0]  ;;  %vm393_vm10 = vweird.f32 %v1861_v53 }
 0x142   : > { %848 = vmatpush.bf16.msra.mxu3 %v1231_v55 }
 0x143   : > { %836 = vmatpush.bf16.msra.mxu2 %v1159_v3  ;;  %v1067_v3 = vor.u32 %v1298_v61, %v1064_v62 }
 0x144   : > { %822 = vmatpush.bf16.msra.mxu1 %v1103_v63  ;;  %v1314_v63 = vld [vmem:[%s1948_s3 + $0xc4] sm:$0xf] }
 0x146   : > { %849 = vmatpush.bf16.msra.mxu3 %v1223_v12  ;;  %v1131_v12 = vor.u32 %v1314_v63, %v1128_v4  ;;  %v1290_v4 = vld [vmem:[%s1948_s3 + $0x4] sm:$0xf] }
 0x147   : > { %881 = vmatpush.bf16.msrb.mxu2 %v1219_v16  ;;  %v1251_v16 = vor.u32 %v1344_v14, %v1248_v15 }
 0x148   : > { %823 = vmatpush.bf16.msra.mxu1 %v1095_v25  ;;  %v1176_v25 = vld [vmem:[%s1948_s3 + $0x128] sm:$0xf0] }
 0x149   : > { %344 = vperm.xlu2 %1367, %v321_v32   ;;  %v1054_v32 = vld [vmem:[%s1948_s3 + $0x30] sm:$0xf]  ;;  %v1179_v28 = vor.u32 %v1326_v22, %v1176_v25 }
 0x14a   : > { %v1055_v35 = vor.u32 %v1297_v33, %v1054_v32  ;;  %894 = vmatpush.bf16.msrb.mxu3 %v1283_v17  ;;  %v1350_v32 = vld [vmem:[%s1948_s3 + $0x1e4] sm:$0xf]  ;;  %v1272_v33 = vld [vmem:[%s1948_s3 + $0x1e8] sm:$0xf0]  ;;  %v1296_v17 = vld [vmem:[%s1948_s3 + $0x34] sm:$0xf] }
 0x14b   : > { %882 = vmatpush.bf16.msrb.mxu2 %v1211_v34  ;;  %v1059_v20 = vor.u32 %v1296_v17, %v1056_v18 }
 0x14c   : > { %807 = vmatpush.bf16.msra.mxu0 %v1055_v35  ;;  %v1275_v35 = vor.u32 %v1350_v32, %v1272_v33  ;;  %868 = vmatpush.bf16.msrb.mxu1 %v1155_v30  ;;  %v1048_v30 = vld [vmem:[%s1948_s3 + $0x28] sm:$0xf0] }
 0x14d   : > { %v1051_v34 = vor.u32 %v1294_v29, %v1048_v30 }
 0x14e   : > { %895 = vmatpush.bf16.msrb.mxu3 %v1275_v35  ;;  %v1112_v35 = vld [vmem:[%s1948_s3 + $0xa8] sm:$0xf0] }
 0x14f   : > { %883 = vmatpush.bf16.msrb.mxu2 %v1203_v44  ;;  %v1115_v38 = vor.u32 %v1310_v31, %v1112_v35  ;;  %v1040_v44 = vld [vmem:[%s1948_s3 + $0x18] sm:$0xf0] }
 0x150   : > { %808 = vmatpush.bf16.msra.mxu0 %v1047_v47  ;;  %v1300_v47 = vld [vmem:[%s1948_s3 + $0x54] sm:$0xf]  ;;  %869 = vmatpush.bf16.msrb.mxu1 %v1147_v43  ;;  %v1235_v43 = vor.u32 %v1340_v40, %v1232_v41 }
 0x151   : > { %v1075_v55 = vor.u32 %v1300_v47, %v1072_v49  ;;  %v1043_v49 = vor.u32 %v1292_v42, %v1040_v44 }
 0x152   : > { %896 = vmatpush.bf16.msrb.mxu3 %v1267_v48 }
 0x153   : > { %884 = vmatpush.bf16.msrb.mxu2 %v1195_v58 }
 0x154   : > { %809 = vmatpush.bf16.msra.mxu0 %v1039_v59  ;;  %v1259_v59 = vor.u32 %v1346_v54, %v1256_v56  ;;  %870 = vmatpush.bf16.msrb.mxu1 %v1139_v57  ;;  %v1107_v54 = vor.u32 %v1308_v45, %v1104_v46 }
 0x156   : > { %897 = vmatpush.bf16.msrb.mxu3 %v1259_v59 }
 0x157   : > { %885 = vmatpush.bf16.msrb.mxu2 %v1187_v13  ;;  %v1096_v13 = vld [vmem:[%s1948_s3 + $0x88] sm:$0xf0] }
 0x158   : > { %810 = vmatpush.bf16.msra.mxu0 %v1031_v21  ;;  %871 = vmatpush.bf16.msrb.mxu1 %v1131_v12  ;;  %v1120_v21 = vld [vmem:[%s1948_s3 + $0xb8] sm:$0xf0]  ;;  %v1035_v12 = vor.u32 %v1290_v4, %v1032_v6 }
 0x159   : > { %v1123_v24 = vor.u32 %v1312_v19, %v1120_v21  ;;  %v1099_v19 = vor.u32 %v1306_v11, %v1096_v13 }
 0x15a   : > { %898 = vmatpush.bf16.msrb.mxu3 %v1251_v16 }
 0x15b   : > { %886 = vmatpush.bf16.msrb.mxu2 %v1179_v28 }
 0x15c   : > { %855 = vmatpush.bf16.msrb.mxu0 %v1091_v26  ;;  %v1342_v26 = vld [vmem:[%s1948_s3 + $0x1a4] sm:$0xf]  ;;  %872 = vmatpush.bf16.msrb.mxu1 %v1123_v24 }
 0x15d   : > { %v1243_v33 = vor.u32 %v1342_v26, %v1240_v27 }
 0x15f   : > { %899 = vmatpush.bf16.msrb.mxu3 %v1243_v33 }
 0x160   : > { %856 = vmatpush.bf16.msrb.mxu0 %v1083_v39  ;;  %v1171_v39 = vor.u32 %v1324_v36, %v1168_v37  ;;  %873 = vmatpush.bf16.msrb.mxu1 %v1115_v38 }
 0x162   : > { %887 = vmatpush.bf16.msrb.mxu2 %v1171_v39 }
 0x163   : > { %900 = vmatpush.bf16.msrb.mxu3 %v1235_v43 }
 0x164   : > { %857 = vmatpush.bf16.msrb.mxu0 %v1075_v55  ;;  %v1224_v55 = vld [vmem:[%s1948_s3 + $0x188] sm:$0xf0]  ;;  %874 = vmatpush.bf16.msrb.mxu1 %v1107_v54 }
 0x165   : > { %v1227_v63 = vor.u32 %v1338_v52, %v1224_v55 }
 0x167   : > { %901 = vmatpush.bf16.msrb.mxu3 %v1227_v63 }
 0x168   : > { %858 = vmatpush.bf16.msrb.mxu0 %v1067_v3  ;;  %875 = vmatpush.bf16.msrb.mxu1 %v1099_v19 }
 0x16c   : > { %859 = vmatpush.bf16.msrb.mxu0 %v1059_v20 }
 0x170   : > { %860 = vmatpush.bf16.msrb.mxu0 %v1051_v34 }
 0x174   : > { %861 = vmatpush.bf16.msrb.mxu0 %v1043_v49 }
 0x178   : > { %862 = vmatpush.bf16.msrb.mxu0 %v1035_v12 }
 0x193   : > { %v1760_v60 = vpop.permute.xlu2 %332 }
 0x194   : > { %v1872_v56 = vmul.f32 %v1760_v60, %v1456_v8 }
 0x1a3   : > { %v345_v32 = vpop.permute.xlu2 %344 }
 0x1a4   : > { %v1847_v47 = vmul.f32 %v345_v32, %v1458_v9  ;;  %v1850_v48 = vmul.f32 %v345_v32, %v1460_v10  ;;  %v1865_v9 = vmul.f32 %v1760_v60, %v1454_v7  ;;  %v1163_v7 = vor.u32 %v1322_v50, %v1160_v51 }
 0x1a6   : > { %v398_v8 = vmax.f32 %v1865_v9, %v1847_v47  ;;  %888 = vmatpush.bf16.msrb.mxu2 %v1163_v7 }
 0x1ab   : > { %v339_v10 = vpop.permute.xlu0 %338 }
 0x1ac   : > { %v1875_v57 = vmul.f32 %v339_v10, %v1444_v2  ;;  %v1878_v58 = vmul.f32 %v339_v10, %v1450_v5  ;;  %v327_v59 = vpop.permute.xlu1 %326  ;;  %v407_v2 = vmax.f32 %v1872_v56, %v1850_v48  ;;  %v389_v5 = vmul.f32 32.0, %v1861_v53 }
 0x1ad   : > { %v1881_v61 = vmul.f32 %v327_v59, %v1440_v0  ;;  %v1884_v62 = vmul.f32 %v327_v59, %v1442_v1 }
 0x1ae   : > { %v390_v18 = vsub.f32 1.0, %v389_v5 }
 0x1af   : > { %v397_v60 = vmax.f32 %v1881_v61, %v1875_v57  ;;  %v406_v0 = vmax.f32 %v1884_v62, %v1878_v58  ;;  %v370_v1 = vadd.f32 %v1865_v9, %v1881_v61  ;;  %v379_v3 = vadd.f32 %v1872_v56, %v1884_v62 }
 0x1b0   : > { %v391_v28 = vmul.f32 %v1861_v53, %v390_v18 }
 0x1b1   : > { %v399_v14 = vmax.f32 %v397_v60, %v398_v8  ;;  %v408_v15 = vmax.f32 %v406_v0, %v407_v2  ;;  %v371_v16 = vadd.f32 %v370_v1, %v1875_v57  ;;  %v380_v17 = vadd.f32 %v379_v3, %v1878_v58 }
 0x1b2   : > { %v392_v37 = vadd.f32 %v1861_v53, %v391_v28 }
 0x1b3   : > { %v400_v20 = vrot.slane %v399_v14, 4  ;;  %v409_v21 = vrot.slane %v408_v15, 4  ;;  %v372_v22 = vadd.f32 %v371_v16, %v1847_v47  ;;  %v381_v23 = vadd.f32 %v380_v17, %v1850_v48 }
 0x1b4   : > { %v394_v46 = vsel %vm393_vm10, %v1861_v53, %v392_v37 }
 0x1b5   : > { %v401_v24 = vmax.f32 %v399_v14, %v400_v20  ;;  %v410_v25 = vmax.f32 %v408_v15, %v409_v21  ;;  %v373_v26 = vrot.slane %v372_v22, 4  ;;  %v382_v27 = vrot.slane %v381_v23, 4 }
 0x1b7   : > { %v402_v29 = vrot.slane %v401_v24, 2  ;;  %v411_v30 = vrot.slane %v410_v25, 2  ;;  %v374_v31 = vadd.f32 %v373_v26, %v372_v22  ;;  %v383_v32 = vadd.f32 %v382_v27, %v381_v23 }
 0x1b9   : > { %v403_v33 = vmax.f32 %v401_v24, %v402_v29  ;;  %v412_v34 = vmax.f32 %v410_v25, %v411_v30  ;;  %v375_v35 = vrot.slane %v374_v31, 2  ;;  %v384_v36 = vrot.slane %v383_v32, 2 }
 0x1bb   : > { %v404_v38 = vrot.slane %v403_v33, 1  ;;  %v413_v39 = vrot.slane %v412_v34, 1  ;;  %v376_v40 = vadd.f32 %v375_v35, %v374_v31  ;;  %v385_v41 = vadd.f32 %v384_v36, %v383_v32 }
 0x1bd   : > { %v405_v42 = vmax.f32 %v403_v33, %v404_v38  ;;  %v414_v43 = vmax.f32 %v412_v34, %v413_v39  ;;  %v377_v44 = vrot.slane %v376_v40, 1  ;;  %v386_v45 = vrot.slane %v385_v41, 1 }
 0x1bf   : > { %v417_v49 = vpack.c.bf16 %v405_v42, %v405_v42  ;;  %v418_v50 = vpack.c.bf16 %v414_v43, %v414_v43  ;;  %v378_v51 = vadd.f32 %v377_v44, %v376_v40  ;;  %v387_v52 = vadd.f32 %v386_v45, %v385_v41 }
 0x1c1   : > { %837 = vmatmul.bf16.vlgmr.msra.gmra.mxu2 %v417_v49  ;;  %850 = vmatmul.bf16.vlgmr.msra.gmra.mxu3 %v418_v50  ;;  %v395_v10 = vmul.f32 %v394_v46, %v378_v51  ;;  %v396_v54 = vmul.f32 %v394_v46, %v387_v52 }
 0x1c3   : > { %v415_v55 = vpack.c.bf16 %v395_v10, %v395_v10  ;;  %v416_v59 = vpack.c.bf16 %v396_v54, %v396_v54 }
 0x1c5   : > { %811 = vmatmul.bf16.vlgmr.msra.gmra.mxu0 %v415_v55  ;;  %824 = vmatmul.bf16.vlgmr.msra.gmra.mxu1 %v416_v59 }
 0x1d1   : > { %889 = vmatmul.bf16.vlgmr.msrb.gmra.mxu2 %v417_v49  ;;  %902 = vmatmul.bf16.vlgmr.msrb.gmra.mxu3 %v418_v50 }
 0x1d5   : > { %863 = vmatmul.bf16.vlgmr.msrb.gmra.mxu0 %v415_v55  ;;  %876 = vmatmul.bf16.vlgmr.msrb.gmra.mxu1 %v416_v59 }
 0x242   : > { %v812_v7 = vpop.f32.mrf.mxu0  ;;  %v825_v63 = vpop.f32.mrf.mxu1 }
 0x243   : > { %v826_v8 = vadd.f32 %v825_v63, %v812_v7 }
 0x244   : > { %v838_v53 = vpop.f32.mrf.mxu2  ;;  %v851_v2 = vpop.f32.mrf.mxu3 }
 0x245   : > { %v839_v5 = vadd.f32 %v838_v53, %v826_v8 }
 0x247   : > { %v852_v60 = vadd.f32 %v851_v2, %v839_v5 }
 0x249   : > { %v1284_v0 = vmul.f32 -1.442695, %v852_v60 }
 0x24a   : > { %v814_v1 = vpop.f32.mrf.mxu0  ;;  %v827_v3 = vpop.f32.mrf.mxu1 }
 0x24b   : > { %1381 = vpow2.f32 %v1284_v0 }
 0x24c   : > { %v840_v4 = vpop.f32.mrf.mxu2  ;;  %v853_v6 = vpop.f32.mrf.mxu3 }
 0x251   : > { %v1382_v11 = vpop.eup %1381 }
 0x252   : > { %v913_v12 = vadd.f32 1.0, %v1382_v11  ;;  %v864_v13 = vpop.f32.mrf.mxu0  ;;  %v877_v14 = vpop.f32.mrf.mxu1 }
 0x253   : > { %v878_v15 = vadd.f32 %v877_v14, %v864_v13 }
 0x254   : > { %1383 = vrcp.f32 %v913_v12  ;;  %v890_v16 = vpop.f32.mrf.mxu2  ;;  %v903_v17 = vpop.f32.mrf.mxu3  ;;  %v926_v28 = vand.u32 2147483648, %v913_v12  ;;  %v924_v30 = vand.u32 2147483647, %v913_v12  ;;  %vm920_vm12 = vweird.f32 %v913_v12 }
 0x255   : > { %v891_v18 = vadd.f32 %v890_v16, %v878_v15 }
 0x256   : > { %v927_v33 = vor.u32 1.1754944e-38, %v926_v28  ;;  %vm925_vm14 = vcmp.eq.f32.partialorder %v924_v30, 8.507059e+37 }
 0x257   : > { %v904_v19 = vadd.f32 %v903_v17, %v891_v18 }
 0x259   : > { %v1285_v20 = vmul.f32 -1.442695, %v904_v19 }
 0x25a   : > { %v1384_v21 = vpop.eup %1383  ;;  %v866_v22 = vpop.f32.mrf.mxu0 }
 0x25b   : > { %v879_v23 = vpop.f32.mrf.mxu1  ;;  %v916_v24 = vmul.f32 %v1384_v21, %v913_v12  ;;  %1385 = vpow2.f32 %v1285_v20  ;;  %vm921_vm11 = vweird.f32 %v1384_v21 }
 0x25c   : > { %v892_v25 = vpop.f32.mrf.mxu2  ;;  %v905_v26 = vpop.f32.mrf.mxu3  ;;  %vm922_vm13 = vmor %vm920_vm12, %vm921_vm11 }
 0x25d   : > { %v917_v27 = vsub.f32 1.0, %v916_v24 }
 0x25f   : > { %v918_v29 = vmul.f32 %v1384_v21, %v917_v27 }
 0x261   : > { %v1386_v31 = vpop.eup %1385  ;;  %v919_v32 = vadd.f32 %v1384_v21, %v918_v29 }
 0x262   : > { %v914_v34 = vadd.f32 1.0, %v1386_v31 }
 0x263   : > { %v923_v35 = vsel %vm922_vm13, %v1384_v21, %v919_v32 }
 0x264   : > { %v928_v36 = vsel %vm925_vm14, %v927_v33, %v923_v35  ;;  %1387 = vrcp.f32 %v914_v34  ;;  %v941_v45 = vand.u32 2147483648, %v914_v34  ;;  %vm935_vm0 = vweird.f32 %v914_v34 }
 0x265   : > { %v945_v37 = vperm.slane %v928_v36, 0 }
 0x267   : > { %v947_v38 = vmul.f32 %v945_v37, %v1881_v61  ;;  %v949_v39 = vmul.f32 %v945_v37, %v1865_v9  ;;  %v951_v40 = vmul.f32 %v945_v37, %v1875_v57  ;;  %v953_v41 = vmul.f32 %v945_v37, %v1847_v47 }
 0x268   : > { %v939_v61 = vand.u32 2147483647, %v914_v34  ;;  %v942_v57 = vor.u32 1.1754944e-38, %v941_v45 }
 0x269   : > { %955 = vst [vmem:[%s1924_s8] sm:$0xff] %v947_v38 }
 0x26a   : > { %v1388_v42 = vpop.eup %1387  ;;  %957 = vst [vmem:[%s1924_s8 + $0x10] sm:$0xff] %v949_v39  ;;  %vm940_vm2 = vcmp.eq.f32.partialorder %v939_v61, 8.507059e+37 }
 0x26b   : > { %959 = vst [vmem:[%s1924_s8 + $0x20] sm:$0xff] %v951_v40  ;;  %v931_v43 = vmul.f32 %v1388_v42, %v914_v34  ;;  %vm936_vm15 = vweird.f32 %v1388_v42 }
 0x26c   : > { %961 = vst [vmem:[%s1924_s8 + $0x30] sm:$0xff] %v953_v41  ;;  %vm937_vm1 = vmor %vm935_vm0, %vm936_vm15 }
 0x26d   : > { %v932_v44 = vsub.f32 1.0, %v931_v43 }
 0x26f   : > { %v933_v46 = vmul.f32 %v1388_v42, %v932_v44 }
 0x271   : > { %v934_v9 = vadd.f32 %v1388_v42, %v933_v46 }
 0x273   : > { %v938_v47 = vsel %vm937_vm1, %v1388_v42, %v934_v9 }
 0x274   : > { %v943_v49 = vsel %vm940_vm2, %v942_v57, %v938_v47 }
 0x275   : > { %v946_v50 = vperm.slane %v943_v49, 0 }
 0x277   : > { %v948_v51 = vmul.f32 %v946_v50, %v1884_v62  ;;  %v950_v52 = vmul.f32 %v946_v50, %v1872_v56  ;;  %v952_v10 = vmul.f32 %v946_v50, %v1878_v58  ;;  %v954_v54 = vmul.f32 %v946_v50, %v1850_v48 }
 0x279   : > { %956 = vst [vmem:[%s1924_s8 + $0x8] sm:$0xff] %v948_v51 }
 0x27a   : > { %958 = vst [vmem:[%s1924_s8 + $0x18] sm:$0xff] %v950_v52 }
 0x27b   : > { %960 = vst [vmem:[%s1924_s8 + $0x28] sm:$0xff] %v952_v10 }
 0x27c   : > { %962 = vst [vmem:[%s1924_s8 + $0x38] sm:$0xff] %v954_v54 }
 0x27d PF: > { %s14_s15 = sadd.s32 1, %s1395_s15  }
 0x27e   : > { %p11_p4 = scmp.ge.s32.totalorder %s14_s15, 4  }
 0x280   :  { %13 = sbr.rel (!%p11_p4) target bundleno = 1 (0x1), region = 66 }

</bundles_post_ra>
